<compile_context>
chip_gen: v7x
topology: tpu7x:2x2x1
jax: 0.10.0
libtpu: 0.0.40
codegen_flags: <defaults>
</compile_context>

<pallas_src>
import math

import jax
import jax.numpy as jnp
from jax.experimental import pallas as pl
from jax.experimental.pallas import tpu as pltpu


# ------------------------------- kernel --------------------------------------

def posenc_kernel(x_ref, pe_ref, o_ref):
    # x_ref : (ts, B, D)  token embeddings
    # pe_ref: (ts, 1, D)  positional encodings, broadcast over batch in VMEM
    # TODO(synk): training-mode dropout (pltpu.prng_* mask + 1/(1-p) scaling) is
    #             not implemented; eval-mode dropout is the identity.
    o_ref[...] = (x_ref[...] + pe_ref[...]).astype(o_ref.dtype)


# --------------------------- PE table (init) ----------------------------------

def make_positional_encoding(emb_size, maxlen=1601, dtype=jnp.float32):
    """Replicates PositionalEncoding.__init__: (maxlen, 1, emb_size)."""
    den = jnp.exp(jnp.arange(0, emb_size, 2, dtype=jnp.float32)
                  * (-math.log(10000.0) / emb_size))
    pos = jnp.arange(0, maxlen, dtype=jnp.float32)[:, None]
    pe = jnp.zeros((maxlen, emb_size), jnp.float32)
    pe = pe.at[:, 0::2].set(jnp.sin(pos * den))
    pe = pe.at[:, 1::2].set(jnp.cos(pos * den))
    return pe[:, None, :].astype(dtype)                       # (maxlen, 1, D)


# ----------------------------- tiling plan ------------------------------------

_LANE = 128
_X_BLOCK_BUDGET = 6 << 20          # ~6 MiB per x block (v7x HBM-roofline sweet spot)


def _round_up(x, m):
    return ((x + m - 1) // m) * m


def _sublane(itemsize):
    return {4: 8, 2: 16, 1: 32}.get(itemsize, 8)


def _plan_tiling(S, B, D, itemsize):
    """Padding-aware sequence tile, grid length, and scoped-VMEM limit."""
    sub = _sublane(itemsize)
    # Padded bytes per sequence row: trailing (B, D) dims map to (sublane, lane).
    row_x = _round_up(B, sub) * _round_up(D, _LANE) * itemsize
    row_pe = sub * _round_up(D, _LANE) * itemsize
    # Working set per seq row: x + out blocks (double-buffered) + pe block (double-buffered).
    per_row = 4 * row_x + 2 * row_pe
    s_pad = _round_up(S, sub)

    # Largest tile keeping the x block near the budget (working set ~ 4x that).
    ts = (4 * _X_BLOCK_BUDGET) // per_row
    ts = max(sub, (ts // sub) * sub)
    ts = min(ts, s_pad)

    # Prefer an even step count >= 2: v7x shards the "parallel" axis over 2 TCs.
    n = pl.cdiv(S, ts)
    if n == 1 and s_pad >= 2 * sub:
        ts = _round_up(pl.cdiv(S, 2), sub)
    elif n > 1 and n % 2 == 1:
        ts_cap = min(s_pad, _round_up(ts + ts // 2, sub))      # allow modestly larger blocks
        for cand in sorted(range(max(2, n - 3), n + 4), key=lambda c: abs(c - n)):
            ts_c = min(_round_up(pl.cdiv(S, cand), sub), ts_cap)
            if pl.cdiv(S, ts_c) % 2 == 0:
                ts = ts_c
                break

    grid = pl.cdiv(S, ts)
    working = ts * per_row
    vmem_limit = max(32 << 20, min(int(working * 1.5) + (4 << 20), 56 << 20))
    return ts, grid, vmem_limit


# ------------------------------- wrapper --------------------------------------

def positional_encoding(token_embedding, pos_embedding, *, donate_input=False):
    """token_embedding: (S, B, D); pos_embedding: (maxlen, 1, D) (PyTorch buffer layout)."""
    S, B, D = token_embedding.shape
    maxlen = pos_embedding.shape[0]
    assert maxlen >= S and pos_embedding.shape[1] == 1 and pos_embedding.shape[2] == D

    dtype = token_embedding.dtype
    pe = pos_embedding.astype(dtype)       # keep PE traffic & in-kernel math in model dtype

    ts, grid, vmem_limit = _plan_tiling(S, B, D, jnp.dtype(dtype).itemsize)

    return pl.pallas_call(
        posenc_kernel,
        out_shape=jax.ShapeDtypeStruct((S, B, D), dtype),
        grid=(grid,),
        in_specs=[
            pl.BlockSpec((ts, B, D), lambda i: (i, 0, 0)),    # token embeddings
            pl.BlockSpec((ts, 1, D), lambda i: (i, 0, 0)),    # PE rows [i*ts, i*ts+ts)
        ],
        out_specs=pl.BlockSpec((ts, B, D), lambda i: (i, 0, 0)),
        compiler_params=pltpu.CompilerParams(
            dimension_semantics=("parallel",),                # shard seq axis over v7x's 2 TCs
            vmem_limit_bytes=vmem_limit,
        ),
        input_output_aliases={0: 0} if donate_input else {},
    )(token_embedding, pe)


# --------------------------------- main ---------------------------------------

if __name__ == "__main__":
    key = jax.random.PRNGKey(0)
    k1, k2 = jax.random.split(key)

    # Small shape consistent with the module (seq-major layout, like PyTorch).
    S, B, D = 8, 2, 16
    x = jax.random.normal(k1, (S, B, D), jnp.float32)
    pe = make_positional_encoding(D)
    out = jax.block_until_ready(positional_encoding(x, pe))
    ref = x + pe[:S]
    assert out.shape == (S, B, D)
    assert bool(jnp.all(jnp.isfinite(out)))
    assert bool(jnp.allclose(out, ref, atol=1e-6, rtol=1e-6))

    # Second shape exercises the cdiv grid with a *partial* last block
    # (S=100 is not a multiple of the chosen tile) and lane-dense (D=128) stores.
    S2, B2, D2 = 100, 4, 128
    x2 = jax.random.normal(k2, (S2, B2, D2), jnp.float32)
    pe2 = make_positional_encoding(D2)
    out2 = jax.block_until_ready(positional_encoding(x2, pe2))
    assert bool(jnp.allclose(out2, x2 + pe2[:S2], atol=1e-6, rtol=1e-6))

    print("KERNEL_OK")
</pallas_src>

<mosaic_0001>
module attributes {stable_mosaic.version = 11 : i64} {
  func.func @posenc_kernel(%arg0: i32, %arg1: memref<8x2x16xf32, #tpu.memory_space<vmem>>, %arg2: memref<8x1x16xf32, #tpu.memory_space<vmem>>, %arg3: memref<8x2x16xf32, #tpu.memory_space<vmem>>) attributes {dimension_semantics = [#tpu.dimension_semantics<parallel>], iteration_bounds = array<i64: 1>, scalar_prefetch = 0 : i64, scratch_operands = 0 : i64, tpu.core_type = #tpu.core_type<tc>, window_params = [{transform_indices = @transform_0, window_bounds = array<i64: 8, 2, 16>}, {transform_indices = @transform_1, window_bounds = array<i64: 8, 1, 16>}, {transform_indices = @transform_2, window_bounds = array<i64: 8, 2, 16>}]} {
    %c0 = arith.constant 0 : index
    %c0_0 = arith.constant 0 : index
    %c0_1 = arith.constant 0 : index
    %0 = vector.load %arg1[%c0, %c0_0, %c0_1] : memref<8x2x16xf32, #tpu.memory_space<vmem>>, vector<8x2x16xf32>
    %c0_2 = arith.constant 0 : index
    %c0_3 = arith.constant 0 : index
    %c0_4 = arith.constant 0 : index
    %1 = vector.load %arg2[%c0_2, %c0_3, %c0_4] : memref<8x1x16xf32, #tpu.memory_space<vmem>>, vector<8x1x16xf32>
    %2 = vector.broadcast %1 : vector<8x1x16xf32> to vector<8x2x16xf32>
    %3 = arith.addf %0, %2 : vector<8x2x16xf32>
    %c0_5 = arith.constant 0 : index
    %c0_6 = arith.constant 0 : index
    %c0_7 = arith.constant 0 : index
    %4 = vector.load %arg3[%c0_5, %c0_6, %c0_7] : memref<8x2x16xf32, #tpu.memory_space<vmem>>, vector<8x2x16xf32>
    tpu.vector_store %arg3[%c0_5, %c0_6, %c0_7], %3 {strides = array<i32>} : memref<8x2x16xf32, #tpu.memory_space<vmem>>, vector<8x2x16xf32>,
    return
  }
  func.func @transform_0(%arg0: i32) -> (i32, i32, i32) {
    %c0_i32 = arith.constant 0 : i32
    %c0_i32_0 = arith.constant 0 : i32
    %c0_i32_1 = arith.constant 0 : i32
    return %arg0, %c0_i32, %c0_i32_0 : i32, i32, i32
  }
  func.func @transform_1(%arg0: i32) -> (i32, i32, i32) {
    %c0_i32 = arith.constant 0 : i32
    %c0_i32_0 = arith.constant 0 : i32
    %c0_i32_1 = arith.constant 0 : i32
    return %arg0, %c0_i32, %c0_i32_0 : i32, i32, i32
  }
  func.func @transform_2(%arg0: i32) -> (i32, i32, i32) {
    %c0_i32 = arith.constant 0 : i32
    %c0_i32_0 = arith.constant 0 : i32
    %c0_i32_1 = arith.constant 0 : i32
    return %arg0, %c0_i32, %c0_i32_0 : i32, i32, i32
  }
}

</mosaic_0001>

<bundles_post_ra>
// kernel: tpu_custom_call.1
= control target key start
LH: loop header
LB: loop body
LE: loop exit
PB: predicated region body
PF: predicated region fallthrough
CT: control target
= control target key end

     0   :  { %vm84_vm0 = vcmask 123904   ;;  %s230_s0 = inlined_call_operand.vmem [shape: f32[8,2,16], index: 0, kind: input, shape index: {}]   ;;  %s231_s1 = inlined_call_operand.vmem [shape: f32[1601,1,16], index: 1, kind: input, shape index: {}]   ;;  %s232_s2 = inlined_call_operand.hbm [shape: f32[8,2,16], index: 2, kind: output, shape index: {}]  }
   0x1   :  { %v12_v0 = vld [vmem:[%s230_s0] sm:$0x3]  ;;  %v13_v3 = vld [vmem:[%s230_s0 + $0x2] sm:$0x3]  ;;  %v14_v5 = vld [vmem:[%s230_s0 + $0x4] sm:$0x3] }
   0x2   :  { %v109_v1 = vld [vmem:[%s231_s1] ss:$0 sm:$0xff]  ;;  %v110_v4 = vld [vmem:[%s231_s1 + $0x1] ss:$0 sm:$0xff]  ;;  %v111_v7 = vld [vmem:[%s231_s1 + $0x2] ss:$0 sm:$0xff] }
   0x3   :  { %v76_v2 = vadd.f32 %v109_v1, %v12_v0  ;;  %v77_v6 = vadd.f32 %v110_v4, %v13_v3  ;;  %v15_v8 = vld [vmem:[%s230_s0 + $0x6] sm:$0x3]  ;;  %v112_v9 = vld [vmem:[%s231_s1 + $0x3] ss:$0 sm:$0xff]  ;;  %v78_v10 = vadd.f32 %v111_v7, %v14_v5  ;;  %v16_v12 = vld [vmem:[%s230_s0 + $0x8] sm:$0x3] }
   0x4   :  { %v79_v11 = vadd.f32 %v112_v9, %v15_v8  ;;  %v113_v13 = vld [vmem:[%s231_s1 + $0x4] ss:$0 sm:$0xff]  ;;  %v17_v14 = vld [vmem:[%s230_s0 + $0xa] sm:$0x3]  ;;  %v114_v16 = vld [vmem:[%s231_s1 + $0x5] ss:$0 sm:$0xff] }
   0x5   :  { %85 = vst.msk [vmem:[#allocation2] sm:$0x3] %vm84_vm0, %v76_v2  ;;  %86 = vst.msk [vmem:[#allocation2 + $0x2] sm:$0x3] %vm84_vm0, %v77_v6  ;;  %v80_v15 = vadd.f32 %v113_v13, %v16_v12  ;;  %v18_v17 = vld [vmem:[%s230_s0 + $0xc] sm:$0x3]  ;;  %v81_v19 = vadd.f32 %v114_v16, %v17_v14 }
   0x6   :  { %v115_v18 = vld [vmem:[%s231_s1 + $0x6] ss:$0 sm:$0xff]  ;;  %87 = vst.msk [vmem:[#allocation2 + $0x4] sm:$0x3] %vm84_vm0, %v78_v10  ;;  %88 = vst.msk [vmem:[#allocation2 + $0x6] sm:$0x3] %vm84_vm0, %v79_v11 }
   0x7   :  { %v82_v20 = vadd.f32 %v115_v18, %v18_v17  ;;  %v19_v21 = vld [vmem:[%s230_s0 + $0xe] sm:$0x3]  ;;  %v116_v22 = vld [vmem:[%s231_s1 + $0x7] ss:$0 sm:$0xff] }
   0x8   :  { %7 = vsyncpa [#allocation3], 0  ;;  %89 = vst.msk [vmem:[#allocation2 + $0x8] sm:$0x3] %vm84_vm0, %v80_v15  ;;  %v83_v23 = vadd.f32 %v116_v22, %v19_v21  ;;  %s144_s13 = smov [#allocation2]  }
   0x9   :  { %s98_s14 = sshll.u32 %s144_s13, 4  ;;  %90 = vst.msk [vmem:[#allocation2 + $0xa] sm:$0x3] %vm84_vm0, %v81_v19  ;;  %91 = vst.msk [vmem:[#allocation2 + $0xc] sm:$0x3] %vm84_vm0, %v82_v20  ;;  %s99_s14 = int_to_ptr.vmem [resolvable:$true] %s98_s14 }
   0xa   :  { %92 = vst.msk [vmem:[#allocation2 + $0xe] sm:$0x3] %vm84_vm0, %v83_v23  ;;  %s120_s15 = scalar_lea.vmem %s99_s14, 256  ;;  %p125_p1 = scmp.lt.s32.totalorder %s99_s14, %s99_s14 }
   0xb   :  { %p121_p0 = scmp.ne.s32.totalorder %s99_s14, %s120_s15  ;;  %p126_p2 = scmp.lt.s32.totalorder %s120_s15, %s120_s15 }
   0xd   :  { %p127_p3 = por %p126_p2, %p125_p1 }
   0xf   :  { %p128_p4 = pnand %p127_p3, %p121_p0 }
  0x11   :  { %131 = shalt.err (!%p128_p4)
}
  0x12   :  { %s132_s16 = scalar_lea.hbm %s232_s2, 256 }
  0x13   :  { %p133_p5 = scmp.ne.s32.totalorder %s232_s2, %s132_s16  ;;  %p136_p6 = scmp.lt.u32.totalorder %s132_s16, %s232_s2 }
  0x15   :  { %p138_p7 = pnand %p136_p6, %p133_p5 }
  0x17   :  { %141 = shalt.err (!%p138_p7)
}
  0x18   :  { %s145_s21 = smov 32   ;;  %s146_s22 = smov 2  }
  0x19   :  { %104 = dma.vmem_to_hbm [thread:$0]  %s99_s14, 256, %s232_s2, [#allocation3], %s145_s21, %s145_s21, %s146_s22  }
  0x1a   :  { %142 = dma.done.wait [#allocation3], 256  }
  0x1b   :  { %143 = vsyncadd [#allocation3], 4294967040 }
  0x1c   :  { %108 = vsyncpa [#allocation3], 1 }

</bundles_post_ra>
